<compile_context>
chip_gen: v7x
topology: tpu7x:2x2x1
jax: 0.10.0
libtpu: 0.0.40
codegen_flags: <defaults>
</compile_context>

<pallas_src>
import functools
import math

import jax
import jax.numpy as jnp
from jax.experimental import pallas as pl
from jax.experimental.pallas import tpu as pltpu

LATENT_DIM = 100
HIDDEN = 128
IMG_SHAPE = (1, 28, 28)
TB_MAX = 1024            # max batch rows per grid step (fits VMEM on all gens)


def _round_up(x, m):
    return (x + m - 1) // m * m


def _supports_bf16_epilogue():
    """bf16 VPU/EUP exists on v6e / v7x; older gens (v2-v5) only do f32."""
    try:
        kind = jax.devices()[0].device_kind.lower()
    except Exception:
        return True
    return not any(tag in kind for tag in ("v2", "v3", "v4", "v5"))


def generator_kernel(z_ref, w1_ref, b1_ref, w2_ref, b2_ref, o_ref, *,
                     bf16_epilogue):
    # Layer 1: (TB, 100)bf16 @ (100, 128)bf16 on the MXU, f32 accumulation.
    z = z_ref[...].astype(jnp.bfloat16)
    h = jnp.dot(z, w1_ref[...], preferred_element_type=jnp.float32)
    # Bias + ReLU in f32 on the VPU.
    h = jnp.maximum(h + b1_ref[...], 0.0)
    # Layer 2: (TB, 128)bf16 @ (128, 784)bf16 on the MXU, f32 accumulation.
    out = jnp.dot(h.astype(jnp.bfloat16), w2_ref[...],
                  preferred_element_type=jnp.float32)
    out = out + b2_ref[...]
    # Tanh epilogue on the EUP; store bf16 (tanh output is bounded in [-1,1]).
    if bf16_epilogue:
        o_ref[...] = jnp.tanh(out.astype(jnp.bfloat16))
    else:
        o_ref[...] = jnp.tanh(out).astype(jnp.bfloat16)


def prepare_params(w1, b1, w2, b2):
    """One-time weight prep (outside the hot path): transpose to (in, out)
    layout and cast matmul weights to bf16; biases stay f32 row vectors.
    No padding needed -- Mosaic handles the K=100 / N=784 shapes directly."""
    w1t = w1.T.astype(jnp.bfloat16)                    # (latent, 128)
    b1r = b1.reshape(1, -1).astype(jnp.float32)        # (1, 128)
    w2t = w2.T.astype(jnp.bfloat16)                    # (128, 784)
    b2r = b2.reshape(1, -1).astype(jnp.float32)        # (1, 784)
    return w1t, b1r, w2t, b2r


def _choose_batch_tile(B):
    """Pick the batch tile TB (multiple of 8) and the grid length."""
    if B <= TB_MAX:
        return _round_up(B, 8), 1
    # Keep the number of tiles even so the "parallel" batch axis splits
    # evenly across v7x's two TensorCores.
    n = pl.cdiv(B, TB_MAX)
    if n % 2:
        n += 1
    tb = _round_up(pl.cdiv(B, n), 8)
    return tb, pl.cdiv(B, tb)


def generator_forward(z, w1t, b1r, w2t, b2r, img_shape=IMG_SHAPE,
                      bf16_epilogue=None):
    """z: (B, latent) float32.  Prepared params from prepare_params().
    Returns (B, *img_shape) bfloat16 (tanh-bounded; stored bf16 for HBM BW)."""
    B, latent = z.shape
    p_out = int(math.prod(img_shape))
    assert w1t.shape == (latent, HIDDEN)
    assert w2t.shape == (HIDDEN, p_out)

    if bf16_epilogue is None:
        bf16_epilogue = _supports_bf16_epilogue()

    tb, nsteps = _choose_batch_tile(B)

    out = pl.pallas_call(
        functools.partial(generator_kernel, bf16_epilogue=bf16_epilogue),
        out_shape=jax.ShapeDtypeStruct((B, p_out), jnp.bfloat16),
        grid=(nsteps,),
        in_specs=[
            pl.BlockSpec((tb, latent), lambda i: (i, 0)),      # z tile
            pl.BlockSpec((latent, HIDDEN), lambda i: (0, 0)),  # w1 (resident)
            pl.BlockSpec((1, HIDDEN), lambda i: (0, 0)),       # b1 (resident)
            pl.BlockSpec((HIDDEN, p_out), lambda i: (0, 0)),   # w2 (resident)
            pl.BlockSpec((1, p_out), lambda i: (0, 0)),        # b2 (resident)
        ],
        out_specs=pl.BlockSpec((tb, p_out), lambda i: (i, 0)),
        compiler_params=pltpu.CompilerParams(
            dimension_semantics=("parallel",),
            vmem_limit_bytes=32 * 1024 * 1024,
        ),
    )(z, w1t, b1r, w2t, b2r)

    return out.reshape(B, *img_shape)


def _init_params(key, latent_dim=LATENT_DIM, img_shape=IMG_SHAPE):
    """Deterministic synthetic init mimicking nn.Linear default U(+-1/sqrt(fan_in))."""
    p_out = int(math.prod(img_shape))
    k1, k2, k3, k4 = jax.random.split(key, 4)
    lim1 = 1.0 / (latent_dim ** 0.5)
    lim2 = 1.0 / (HIDDEN ** 0.5)
    w1 = jax.random.uniform(k1, (HIDDEN, latent_dim), jnp.float32, -lim1, lim1)
    b1 = jax.random.uniform(k2, (HIDDEN,), jnp.float32, -lim1, lim1)
    w2 = jax.random.uniform(k3, (p_out, HIDDEN), jnp.float32, -lim2, lim2)
    b2 = jax.random.uniform(k4, (p_out,), jnp.float32, -lim2, lim2)
    return w1, b1, w2, b2


if __name__ == "__main__":
    B = 8   # small demo batch; kernel tiles / core-splits automatically at large B

    key = jax.random.PRNGKey(0)
    kz, kp = jax.random.split(key)
    z = jax.random.normal(kz, (B, LATENT_DIM), jnp.float32)
    w1, b1, w2, b2 = _init_params(kp, LATENT_DIM, IMG_SHAPE)

    # One-time param prep (transpose/cast), then the fused kernel call.
    w1t, b1r, w2t, b2r = prepare_params(w1, b1, w2, b2)
    img = generator_forward(z, w1t, b1r, w2t, b2r, IMG_SHAPE)
    jax.block_until_ready(img)

    # Pure-f32 JAX reference (bf16 matmuls + bf16 store -> loose tolerance;
    # tanh output is bounded in [-1, 1]).
    h_ref = jnp.maximum(z @ w1.T + b1, 0.0)
    ref = jnp.tanh(h_ref @ w2.T + b2).reshape(B, *IMG_SHAPE)
    assert img.shape == (B, 1, 28, 28)
    assert img.dtype == jnp.bfloat16
    err = float(jnp.max(jnp.abs(img.astype(jnp.float32) - ref)))
    assert err < 3e-2, err

    print("KERNEL_OK")
</pallas_src>

<mosaic_0001>
module attributes {stable_mosaic.version = 11 : i64} {
  func.func @generator_kernel(%arg0: i32, %arg1: memref<8x100xf32, #tpu.memory_space<vmem>>, %arg2: memref<100x128xbf16, #tpu.memory_space<vmem>>, %arg3: memref<1x128xf32, #tpu.memory_space<vmem>>, %arg4: memref<128x784xbf16, #tpu.memory_space<vmem>>, %arg5: memref<1x784xf32, #tpu.memory_space<vmem>>, %arg6: memref<8x784xbf16, #tpu.memory_space<vmem>>) attributes {dimension_semantics = [#tpu.dimension_semantics<parallel>], iteration_bounds = array<i64: 1>, scalar_prefetch = 0 : i64, scratch_operands = 0 : i64, tpu.core_type = #tpu.core_type<tc>, window_params = [{transform_indices = @transform_0, window_bounds = array<i64: 8, 100>}, {pipeline_mode = #tpu.pipeline_mode<synchronous>, transform_indices = @transform_1, window_bounds = array<i64: 100, 128>}, {pipeline_mode = #tpu.pipeline_mode<synchronous>, transform_indices = @transform_2, window_bounds = array<i64: 1, 128>}, {pipeline_mode = #tpu.pipeline_mode<synchronous>, transform_indices = @transform_3, window_bounds = array<i64: 128, 784>}, {pipeline_mode = #tpu.pipeline_mode<synchronous>, transform_indices = @transform_4, window_bounds = array<i64: 1, 784>}, {transform_indices = @transform_5, window_bounds = array<i64: 8, 784>}]} {
    %c0 = arith.constant 0 : index
    %c0_0 = arith.constant 0 : index
    %0 = vector.load %arg1[%c0, %c0_0] : memref<8x100xf32, #tpu.memory_space<vmem>>, vector<8x100xf32>
    %1 = arith.truncf %0 : vector<8x100xf32> to vector<8x100xbf16>
    %c0_1 = arith.constant 0 : index
    %c0_2 = arith.constant 0 : index
    %2 = vector.load %arg2[%c0_1, %c0_2] : memref<100x128xbf16, #tpu.memory_space<vmem>>, vector<100x128xbf16>
    %cst = arith.constant dense<0.000000e+00> : vector<8x128xf32>
    %3 = tpu.matmul %1, %2, %cst {dimension_numbers = #tpu.dot_dimension_numbers<[1], [0], [0], [1], [0, 0, 1, 1], [], []>} : vector<8x100xbf16>, vector<100x128xbf16>, vector<8x128xf32> -> vector<8x128xf32>
    %c0_3 = arith.constant 0 : index
    %c0_4 = arith.constant 0 : index
    %4 = vector.load %arg3[%c0_3, %c0_4] : memref<1x128xf32, #tpu.memory_space<vmem>>, vector<1x128xf32>
    %5 = vector.broadcast %4 : vector<1x128xf32> to vector<8x128xf32>
    %6 = arith.addf %3, %5 : vector<8x128xf32>
    %cst_5 = arith.constant 0.000000e+00 : f32
    %7 = vector.broadcast %cst_5 : f32 to vector<8x128xf32>
    %8 = arith.maximumf %6, %7 : vector<8x128xf32>
    %9 = arith.truncf %8 : vector<8x128xf32> to vector<8x128xbf16>
    %c0_6 = arith.constant 0 : index
    %c0_7 = arith.constant 0 : index
    %10 = vector.load %arg4[%c0_6, %c0_7] : memref<128x784xbf16, #tpu.memory_space<vmem>>, vector<128x784xbf16>
    %cst_8 = arith.constant dense<0.000000e+00> : vector<8x784xf32>
    %11 = tpu.matmul %9, %10, %cst_8 {dimension_numbers = #tpu.dot_dimension_numbers<[1], [0], [0], [1], [0, 0, 1, 1], [], []>} : vector<8x128xbf16>, vector<128x784xbf16>, vector<8x784xf32> -> vector<8x784xf32>
    %c0_9 = arith.constant 0 : index
    %c0_10 = arith.constant 0 : index
    %12 = vector.load %arg5[%c0_9, %c0_10] : memref<1x784xf32, #tpu.memory_space<vmem>>, vector<1x784xf32>
    %13 = vector.broadcast %12 : vector<1x784xf32> to vector<8x784xf32>
    %14 = arith.addf %11, %13 : vector<8x784xf32>
    %15 = arith.truncf %14 : vector<8x784xf32> to vector<8x784xbf16>
    %16 = math.tanh %15 : vector<8x784xbf16>
    %c0_11 = arith.constant 0 : index
    %c0_12 = arith.constant 0 : index
    %17 = vector.load %arg6[%c0_11, %c0_12] : memref<8x784xbf16, #tpu.memory_space<vmem>>, vector<8x784xbf16>
    tpu.vector_store %arg6[%c0_11, %c0_12], %16 {strides = array<i32>} : memref<8x784xbf16, #tpu.memory_space<vmem>>, vector<8x784xbf16>,
    return
  }
  func.func @transform_0(%arg0: i32) -> (i32, i32) {
    %c0_i32 = arith.constant 0 : i32
    %c0_i32_0 = arith.constant 0 : i32
    return %arg0, %c0_i32 : i32, i32
  }
  func.func @transform_1(%arg0: i32) -> (i32, i32) {
    %c0_i32 = arith.constant 0 : i32
    %c0_i32_0 = arith.constant 0 : i32
    %c0_i32_1 = arith.constant 0 : i32
    return %c0_i32, %c0_i32_0 : i32, i32
  }
  func.func @transform_2(%arg0: i32) -> (i32, i32) {
    %c0_i32 = arith.constant 0 : i32
    %c0_i32_0 = arith.constant 0 : i32
    %c0_i32_1 = arith.constant 0 : i32
    return %c0_i32, %c0_i32_0 : i32, i32
  }
  func.func @transform_3(%arg0: i32) -> (i32, i32) {
    %c0_i32 = arith.constant 0 : i32
    %c0_i32_0 = arith.constant 0 : i32
    %c0_i32_1 = arith.constant 0 : i32
    return %c0_i32, %c0_i32_0 : i32, i32
  }
  func.func @transform_4(%arg0: i32) -> (i32, i32) {
    %c0_i32 = arith.constant 0 : i32
    %c0_i32_0 = arith.constant 0 : i32
    %c0_i32_1 = arith.constant 0 : i32
    return %c0_i32, %c0_i32_0 : i32, i32
  }
  func.func @transform_5(%arg0: i32) -> (i32, i32) {
    %c0_i32 = arith.constant 0 : i32
    %c0_i32_0 = arith.constant 0 : i32
    return %arg0, %c0_i32 : i32, i32
  }
}

</mosaic_0001>

<bundles_post_ra>
// kernel: tpu_custom_call.1
= control target key start
LH: loop header
LB: loop body
LE: loop exit
PB: predicated region body
PF: predicated region fallthrough
CT: control target
= control target key end

     0   :  { %v993_v1 = vmov 0.0   ;;  %vm994_vm0 = vmmov 0   ;;  %vm87_vm1 = vcmask 1041408   ;;  %vm83_vm2 = vcmask 818176   ;;  %s1256_s0 = inlined_call_operand.vmem [shape: f32[8,100], index: 0, kind: input, shape index: {}]   ;;  %s1257_s1 = inlined_call_operand.vmem [shape: bf16[100,128], index: 1, kind: input, shape index: {}]   ;;  %s1258_s2 = inlined_call_operand.vmem [shape: f32[1,128], index: 2, kind: input, shape index: {}]   ;;  %s1259_s3 = inlined_call_operand.vmem [shape: bf16[128,784], index: 3, kind: input, shape index: {}]   ;;  %s1260_s4 = inlined_call_operand.vmem [shape: f32[1,784], index: 4, kind: input, shape index: {}]   ;;  %s1261_s5 = inlined_call_operand.hbm [shape: bf16[8,784], index: 5, kind: output, shape index: {}]  }
   0x1   :  { %v868_v0 = vld [vmem:[%s1257_s1] sm:$0xff]   ;;  %826 = vmatprep.subr.bf16.mxu0 %v993_v1  ;;  %v869_v2 = vld [vmem:[%s1257_s1 + $0x8] sm:$0xff]   ;;  %840 = vmatprep.mubr.msk.bf16.mxu0 %vm994_vm0, %v993_v1  ;;  %v870_v3 = vld [vmem:[%s1257_s1 + $0x10] sm:$0xff]  }
   0x2   :  { %827 = vmatpush3.bf16.msra.mxu0 %v868_v0  ;;  %v875_v4 = vld [vmem:[%s1259_s3 + $0x4] ss:$28 sps:$4 sm:$0xff]   ;;  %v871_v5 = vld [vmem:[%s1257_s1 + $0x18] sm:$0xff]   ;;  %v887_v9 = vld [vmem:[%s1259_s3 + $0x74] ss:$28 sps:$4 sm:$0xff]  }
   0x3   :  { %828 = vmatprep.subr.bf16.mxu0 %v993_v1  ;;  %522 = vmatprep.subr.bf16.mxu1 %v875_v4  ;;  %v880_v6 = vld [vmem:[%s1259_s3] ss:$28 sps:$4 sm:$0xff]   ;;  %v886_v8 = vld [vmem:[%s1259_s3 + $0x38] ss:$28 sps:$4 sm:$0xff]   ;;  %v892_v11 = vld [vmem:[%s1259_s3 + $0x70] ss:$28 sps:$4 sm:$0xff]  }
   0x4   :  { %v881_v7 = vld [vmem:[%s1259_s3 + $0x3c] ss:$28 sps:$4 sm:$0xff]   ;;  %523 = vmatpush1.bf16.msra.mxu1 %v880_v6  ;;  %v872_v10 = vld [vmem:[%s1257_s1 + $0x20] sm:$0xff]   ;;  %v893_v12 = vld [vmem:[%s1259_s3 + $0xac] ss:$28 sps:$4 sm:$0xff]  }
   0x5   :  { %524 = vmatprep.subr.bf16.mxu1 %v881_v7  ;;  %v873_v13 = vld [vmem:[%s1257_s1 + $0x28] sm:$0xff]   ;;  %v874_v14 = vld [vmem:[%s1257_s1 + $0x30] ss:$0 sps:$4 sm:$0x33]   ;;  %v899_v16 = vld [vmem:[%s1259_s3 + $0xe4] ss:$28 sps:$4 sm:$0xff]  }
   0x6   :  { %829 = vmatpush3.bf16.msra.mxu0 %v869_v2  ;;  %v898_v15 = vld [vmem:[%s1259_s3 + $0xa8] ss:$28 sps:$4 sm:$0xff]   ;;  %v89_v19 = vsel %vm87_vm1, %v874_v14, 0  ;;  %v904_v20 = vld [vmem:[%s1259_s3 + $0xe0] ss:$28 sps:$4 sm:$0xff]  }
   0x7   :  { %830 = vmatprep.subr.bf16.mxu0 %v993_v1  ;;  %v22_v17 = vld [vmem:[%s1256_s0] sm:$0xff]  ;;  %v879_v18 = vld [vmem:[%s1259_s3 + $0xc] ss:$28 sps:$4 sm:$0xff]   ;;  %v905_v21 = vld [vmem:[%s1259_s3 + $0x11c] ss:$28 sps:$4 sm:$0xff]  }
   0x8   :  { %525 = vmatpush1.bf16.msra.mxu1 %v886_v8  ;;  %v23_v22 = vpack.c.bf16 %v22_v17, %v22_v17  ;;  %v877_v23 = vld [vmem:[%s1259_s3 + $0x8] ss:$28 sps:$4 sm:$0xff]   ;;  %v910_v25 = vld [vmem:[%s1259_s3 + $0x118] ss:$28 sps:$4 sm:$0xff]   ;;  %v883_v27 = vld [vmem:[%s1259_s3 + $0x40] ss:$28 sps:$4 sm:$0xff]  }
   0x9   :  { %526 = vmatprep.subr.bf16.mxu1 %v887_v9  ;;  %v885_v24 = vld [vmem:[%s1259_s3 + $0x44] ss:$28 sps:$4 sm:$0xff]   ;;  %v911_v26 = vld [vmem:[%s1259_s3 + $0x154] ss:$28 sps:$4 sm:$0xff]   ;;  %v891_v28 = vld [vmem:[%s1259_s3 + $0x7c] ss:$28 sps:$4 sm:$0xff]  }
   0xa   :  { %831 = vmatpush3.bf16.msra.mxu0 %v870_v3  ;;  %v916_v29 = vld [vmem:[%s1259_s3 + $0x150] ss:$28 sps:$4 sm:$0xff]   ;;  %v889_v30 = vld [vmem:[%s1259_s3 + $0x78] ss:$28 sps:$4 sm:$0xff]  }
   0xb   :  { %832 = vmatprep.subr.bf16.mxu0 %v993_v1  ;;  %v897_v31 = vld [vmem:[%s1259_s3 + $0xb4] ss:$28 sps:$4 sm:$0xff]  }
   0xc   :  { %527 = vmatpush1.bf16.msra.mxu1 %v892_v11  ;;  %v895_v32 = vld [vmem:[%s1259_s3 + $0xb0] ss:$28 sps:$4 sm:$0xff]  }
   0xd   :  { %528 = vmatprep.subr.bf16.mxu1 %v893_v12 }
   0xe   :  { %833 = vmatpush3.bf16.msra.mxu0 %v871_v5 }
   0xf   :  { %834 = vmatprep.subr.bf16.mxu0 %v993_v1 }
  0x10   :  { %529 = vmatpush1.bf16.msra.mxu1 %v898_v15 }
  0x11   :  { %530 = vmatprep.subr.bf16.mxu1 %v899_v16 }
  0x12   :  { %835 = vmatpush3.bf16.msra.mxu0 %v872_v10 }
  0x13   :  { %836 = vmatprep.subr.bf16.mxu0 %v993_v1 }
  0x14   :  { %531 = vmatpush1.bf16.msra.mxu1 %v904_v20 }
  0x15   :  { %532 = vmatprep.subr.bf16.mxu1 %v905_v21 }
  0x16   :  { %837 = vmatpush3.bf16.msra.mxu0 %v873_v13 }
  0x17   :  { %838 = vmatprep.subr.bf16.mxu0 %v993_v1 }
  0x18   :  { %533 = vmatpush1.bf16.msra.mxu1 %v910_v25 }
  0x19   :  { %534 = vmatprep.subr.bf16.mxu1 %v911_v26 }
  0x1a   :  { %839 = vmatpush3.bf16.msra.mxu0 %v89_v19 }
  0x1b   :  { %563 = vmatprep.subr.bf16.mxu0 %v879_v18 }
  0x1c   :  { %535 = vmatpush1.bf16.msra.mxu1 %v916_v29 }
  0x1d   :  { %841 = vmatmul.mubr.msk.bf16.vlgmr.msra.gmra.mrb[0].mxu0 %vm83_vm2, %v23_v22 }
  0x1e   :  { %564 = vmatpush1.bf16.msra.mxu0 %v877_v23 }
  0x1f   :  { %565 = vmatprep.subr.bf16.mxu0 %v885_v24 }
  0x22   :  { %566 = vmatpush1.bf16.msra.mxu0 %v883_v27 }
  0x23   :  { %567 = vmatprep.subr.bf16.mxu0 %v891_v28 }
  0x26   :  { %568 = vmatpush1.bf16.msra.mxu0 %v889_v30 }
  0x27   :  { %10 = vsyncpa [#allocation3], 0  ;;  %569 = vmatprep.subr.bf16.mxu0 %v897_v31  ;;  %v903_v33 = vld [vmem:[%s1259_s3 + $0xec] ss:$28 sps:$4 sm:$0xff]   ;;  %v909_v35 = vld [vmem:[%s1259_s3 + $0x124] ss:$28 sps:$4 sm:$0xff]   ;;  %v199_v13 = vlaneseq }
  0x28   :  { %v901_v34 = vld [vmem:[%s1259_s3 + $0xe8] ss:$28 sps:$4 sm:$0xff]   ;;  %v907_v36 = vld [vmem:[%s1259_s3 + $0x120] ss:$28 sps:$4 sm:$0xff]   ;;  %v913_v38 = vld [vmem:[%s1259_s3 + $0x158] ss:$28 sps:$4 sm:$0xff]  }
  0x29   :  { %v915_v37 = vld [vmem:[%s1259_s3 + $0x15c] ss:$28 sps:$4 sm:$0xff]   ;;  %v917_v39 = vld [vmem:[%s1259_s3 + $0x18c] ss:$28 sps:$4 sm:$0xff]   ;;  %v921_v40 = vld [vmem:[%s1259_s3 + $0x194] ss:$28 sps:$4 sm:$0xff]  }
  0x2a   :  { %570 = vmatpush1.bf16.msra.mxu0 %v895_v32  ;;  %v919_v41 = vld [vmem:[%s1259_s3 + $0x190] ss:$28 sps:$4 sm:$0xff]   ;;  %v922_v42 = vld [vmem:[%s1259_s3 + $0x188] ss:$28 sps:$4 sm:$0xff]   ;;  %536 = vmatprep.subr.bf16.mxu1 %v917_v39  ;;  %v995_v44 = vmov 0   ;;  %v200_v14 = vshrl.u32 %v199_v13, 7 }
  0x2b   :  { %571 = vmatprep.subr.bf16.mxu0 %v903_v33  ;;  %537 = vmatpush1.bf16.msra.mxu1 %v922_v42  ;;  %v925_v43 = vld [vmem:[%s1259_s3 + $0x14] ss:$28 sps:$4 sm:$0xff]   ;;  %v740_v45 = vld [vmem:[%s1258_s2] ss:$0 sm:$0xff]  ;;  %v929_v55 = vld [vmem:[%s1259_s3 + $0x4c] ss:$28 sps:$4 sm:$0xff]  }
  0x2c   :  { %554 = vmatprep.mubr.bf16.mxu1 %v995_v44  ;;  %595 = vmatprep.mubr.bf16.mxu0 %v995_v44  ;;  %v923_v52 = vld [vmem:[%s1259_s3 + $0x10] ss:$28 sps:$4 sm:$0xff]   ;;  %v926_v53 = vld [vmem:[%s1259_s3 + $0x18] ss:$28 sps:$4 sm:$0xff]   ;;  %v927_v56 = vld [vmem:[%s1259_s3 + $0x48] ss:$28 sps:$4 sm:$0xff]  }
  0x2d   :  { %604 = vmatprep.subr.bf16.mxu1 %v925_v43  ;;  %v930_v57 = vld [vmem:[%s1259_s3 + $0x50] ss:$28 sps:$4 sm:$0xff]   ;;  %v933_v58 = vld [vmem:[%s1259_s3 + $0x84] ss:$28 sps:$4 sm:$0xff]   ;;  %v937_v61 = vld [vmem:[%s1259_s3 + $0xbc] ss:$28 sps:$4 sm:$0xff]  }
  0x2e   :  { %572 = vmatpush1.bf16.msra.mxu0 %v901_v34  ;;  %v931_v59 = vld [vmem:[%s1259_s3 + $0x80] ss:$28 sps:$4 sm:$0xff]   ;;  %v934_v60 = vld [vmem:[%s1259_s3 + $0x88] ss:$28 sps:$4 sm:$0xff]   ;;  %v935_v62 = vld [vmem:[%s1259_s3 + $0xb8] ss:$28 sps:$4 sm:$0xff]  }
  0x2f   :  { %573 = vmatprep.subr.bf16.mxu0 %v909_v35  ;;  %v938_v63 = vld [vmem:[%s1259_s3 + $0xc0] ss:$28 sps:$4 sm:$0xff]   ;;  %v941_v0 = vld [vmem:[%s1259_s3 + $0xf4] ss:$28 sps:$4 sm:$0xff]   ;;  %v945_v4 = vld [vmem:[%s1259_s3 + $0x12c] ss:$28 sps:$4 sm:$0xff]  }
  0x30   :  { %v939_v2 = vld [vmem:[%s1259_s3 + $0xf0] ss:$28 sps:$4 sm:$0xff]   ;;  %v942_v3 = vld [vmem:[%s1259_s3 + $0xf8] ss:$28 sps:$4 sm:$0xff]   ;;  %v943_v5 = vld [vmem:[%s1259_s3 + $0x128] ss:$28 sps:$4 sm:$0xff]  }
  0x31   :  { %v946_v6 = vld [vmem:[%s1259_s3 + $0x130] ss:$28 sps:$4 sm:$0xff]   ;;  %v949_v7 = vld [vmem:[%s1259_s3 + $0x164] ss:$28 sps:$4 sm:$0xff]   ;;  %v953_v10 = vld [vmem:[%s1259_s3 + $0x19c] ss:$28 sps:$4 sm:$0xff]  }
  0x32   :  { %574 = vmatpush1.bf16.msra.mxu0 %v907_v36  ;;  %v947_v8 = vld [vmem:[%s1259_s3 + $0x160] ss:$28 sps:$4 sm:$0xff]   ;;  %v950_v9 = vld [vmem:[%s1259_s3 + $0x168] ss:$28 sps:$4 sm:$0xff]   ;;  %v951_v11 = vld [vmem:[%s1259_s3 + $0x198] ss:$28 sps:$4 sm:$0xff]  }
  0x33   :  { %575 = vmatprep.subr.bf16.mxu0 %v915_v37  ;;  %v954_v12 = vld [vmem:[%s1259_s3 + $0x1a0] ss:$28 sps:$4 sm:$0xff]   ;;  %v201_v15 = vsub.s32 0, %v200_v14  ;;  %v209_v16 = vsub.s32 2, %v200_v14  ;;  %v205_v18 = vsub.s32 1, %v200_v14  ;;  %v213_v19 = vsub.s32 3, %v200_v14 }
  0x34   :  { %v197_v17 = vld [vmem:[%s1260_s4] sm:$0x7f]  ;;  %s996_s3 = smov [#allocation2]   ;;  %vm724_vm3 = vcmask 125952  }
  0x35   :  { %v202_v20 = vrot.slane %v197_v17, %v201_v15  ;;  %v210_v21 = vrot.slane %v197_v17, %v209_v16  ;;  %v206_v22 = vrot.slane %v197_v17, %v205_v18  ;;  %v214_v23 = vrot.slane %v197_v17, %v213_v19  ;;  %s732_s4 = sshll.u32 %s996_s3, 4  ;;  %s733_s4 = int_to_ptr.vmem [resolvable:$true] %s732_s4 }
  0x36   :  { %576 = vmatpush1.bf16.msra.mxu0 %v913_v38  ;;  %s969_s15 = scalar_lea.vmem %s733_s4, 448  ;;  %p974_p1 = scmp.lt.s32.totalorder %s733_s4, %s733_s4 }
  0x37   :  { %577 = vmatprep.subr.bf16.mxu0 %v921_v40  ;;  %p970_p0 = scmp.ne.s32.totalorder %s733_s4, %s969_s15  ;;  %p975_p2 = scmp.lt.s32.totalorder %s969_s15, %s969_s15 }
  0x39   :  { %p976_p3 = por %p975_p2, %p974_p1 }
  0x3a   :  { %578 = vmatpush1.bf16.msra.mxu0 %v919_v41 }
  0x3b   :  { %844 = vmatprep.subr.bf16.mxu0 %v993_v1  ;;  %p977_p4 = pnand %p976_p3, %p970_p0 }
  0xf0   :  { %v125_v46 = vpop.f32.mrb[0].mxu0 }
  0xf1   :  { %v126_v47 = vadd.f32 %v740_v45, %v125_v46  ;;  %v842_v48 = vpop.f32.mrb[1].mxu0  ;;  %v217_v45 = vsub.s32 4, %v200_v14  ;;  %v225_v46 = vsub.s32 6, %v200_v14 }
  0xf2   :  { %v128_v49 = vpop.f32.mrb[2].mxu0 }
  0xf3   :  { %v131_v50 = vmax.f32 %v126_v47, 0.0  ;;  %v843_v51 = vpop.f32.mrb[3].mxu0  ;;  %v221_v47 = vsub.s32 5, %v200_v14  ;;  %v218_v48 = vrot.slane %v197_v17, %v217_v45  ;;  %v226_v49 = vrot.slane %v197_v17, %v225_v46 }
  0xf5   :  { %v132_v54 = vpack.c.bf16 %v131_v50, %v131_v50  ;;  %v222_v50 = vrot.slane %v197_v17, %v221_v47 }
  0xf7   :  { %555 = vmatmul.mubr.bf16.vlgmr.msra.gmra.mrb[0].mxu1 %v132_v54  ;;  %596 = vmatmul.mubr.bf16.vlgmr.msra.gmra.mrb[4].mxu0 %v132_v54 }
  0xf8   :  { %605 = vmatpush1.bf16.msra.mxu1 %v923_v52  ;;  %845 = vmatpush3.bf16.msra.mxu0 %v926_v53 }
  0xf9   :  { %606 = vmatprep.subr.bf16.mxu1 %v929_v55  ;;  %846 = vmatprep.subr.bf16.mxu0 %v993_v1 }
  0xfa   :  { %636 = vmatprep.mubr.bf16.mxu1 %v995_v44  ;;  %860 = vmatprep.mubr.msk.bf16.mxu0 %vm994_vm0, %v993_v1 }
  0xfc   :  { %607 = vmatpush1.bf16.msra.mxu1 %v927_v56  ;;  %847 = vmatpush3.bf16.msra.mxu0 %v930_v57 }
  0xfd   :  { %608 = vmatprep.subr.bf16.mxu1 %v933_v58  ;;  %848 = vmatprep.subr.bf16.mxu0 %v993_v1 }
 0x100   :  { %609 = vmatpush1.bf16.msra.mxu1 %v931_v59  ;;  %849 = vmatpush3.bf16.msra.mxu0 %v934_v60 }
 0x101   :  { %610 = vmatprep.subr.bf16.mxu1 %v937_v61  ;;  %850 = vmatprep.subr.bf16.mxu0 %v993_v1 }
 0x104   :  { %611 = vmatpush1.bf16.msra.mxu1 %v935_v62  ;;  %851 = vmatpush3.bf16.msra.mxu0 %v938_v63 }
 0x105   :  { %612 = vmatprep.subr.bf16.mxu1 %v941_v0  ;;  %852 = vmatprep.subr.bf16.mxu0 %v993_v1 }
 0x108   :  { %613 = vmatpush1.bf16.msra.mxu1 %v939_v2  ;;  %853 = vmatpush3.bf16.msra.mxu0 %v942_v3 }
 0x109   :  { %614 = vmatprep.subr.bf16.mxu1 %v945_v4  ;;  %854 = vmatprep.subr.bf16.mxu0 %v993_v1 }
 0x10c   :  { %615 = vmatpush1.bf16.msra.mxu1 %v943_v5  ;;  %855 = vmatpush3.bf16.msra.mxu0 %v946_v6 }
 0x10d   :  { %616 = vmatprep.subr.bf16.mxu1 %v949_v7  ;;  %856 = vmatprep.subr.bf16.mxu0 %v993_v1 }
 0x110   :  { %617 = vmatpush1.bf16.msra.mxu1 %v947_v8  ;;  %857 = vmatpush3.bf16.msra.mxu0 %v950_v9 }
 0x111   :  { %618 = vmatprep.subr.bf16.mxu1 %v953_v10  ;;  %858 = vmatprep.subr.bf16.mxu0 %v993_v1 }
 0x114   :  { %619 = vmatpush1.bf16.msra.mxu1 %v951_v11  ;;  %859 = vmatpush3.bf16.msra.mxu0 %v954_v12 }
 0x117   :  { %637 = vmatmul.mubr.bf16.vlgmr.msra.gmra.mrb[4].mxu1 %v132_v54  ;;  %861 = vmatmul.mubr.bf16.vlgmr.msra.gmra.mrb[8].mxu0 %v132_v54 }
 0x1ca   :  { %v556_v24 = vpop.f32.mrb[0].mxu1  ;;  %v597_v1 = vpop.f32.mrb[4].mxu0 }
 0x1cb   :  { %v557_v25 = vadd.f32 %v556_v24, %v202_v20  ;;  %v598_v26 = vadd.f32 %v597_v1, %v210_v21  ;;  %v558_v27 = vpop.f32.mrb[1].mxu1  ;;  %v599_v28 = vpop.f32.mrb[5].mxu0 }
 0x1cc   :  { %v559_v29 = vadd.f32 %v558_v27, %v206_v22  ;;  %v600_v30 = vadd.f32 %v599_v28, %v214_v23  ;;  %v560_v31 = vpop.f32.mrb[2].mxu1  ;;  %v601_v32 = vpop.f32.mrb[6].mxu0 }
 0x1cd   :  { %v685_v33 = vpack.c.bf16 %v557_v25, %v557_v25  ;;  %v687_v34 = vpack.c.bf16 %v598_v26, %v598_v26  ;;  %v561_v35 = vpop.f32.mrb[3].mxu1  ;;  %v602_v36 = vpop.f32.mrb[7].mxu0 }
 0x1ce   :  { %v686_v37 = vpack.c.bf16 %v559_v29, %v559_v29  ;;  %v688_v38 = vpack.c.bf16 %v600_v30, %v600_v30 }
 0x1cf   :  { %955 = vtanh.bf16 %v685_v33 }
 0x1d0   :  { %957 = vtanh.bf16 %v687_v34 }
 0x1d1   :  { %959 = vtanh.bf16 %v686_v37 }
 0x1d2   :  { %961 = vtanh.bf16 %v688_v38 }
 0x1da   :  { %v956_v39 = vpop.eup %955 }
 0x1db   :  { %v958_v40 = vpop.eup %957 }
 0x1dc   :  { %v960_v41 = vpop.eup %959 }
 0x1dd   :  { %v962_v42 = vpop.eup %961  ;;  %v805_v43 = vcombine.low %v956_v39, %v960_v41 }
 0x1de   :  { %v806_v44 = vcombine.low %v958_v40, %v962_v42 }
 0x1df   :  { %721 = vst [vmem:[#allocation2] sm:$0xff] %v805_v43 }
 0x1e0   :  { %722 = vst [vmem:[#allocation2 + $0x8] sm:$0xff] %v806_v44 }
 0x1ea   :  { %v638_v51 = vpop.f32.mrb[4].mxu1  ;;  %v679_v52 = vpop.f32.mrb[8].mxu0 }
 0x1eb   :  { %v639_v53 = vadd.f32 %v638_v51, %v218_v48  ;;  %v680_v54 = vadd.f32 %v679_v52, %v226_v49  ;;  %v640_v55 = vpop.f32.mrb[5].mxu1  ;;  %v862_v56 = vpop.f32.mrb[9].mxu0 }
 0x1ec   :  { %v641_v57 = vadd.f32 %v640_v55, %v222_v50  ;;  %v642_v58 = vpop.f32.mrb[6].mxu1  ;;  %v682_v59 = vpop.f32.mrb[10].mxu0 }
 0x1ed   :  { %v689_v60 = vpack.c.bf16 %v639_v53, %v639_v53  ;;  %v691_v61 = vpack.c.bf16 %v680_v54, %v680_v54  ;;  %v643_v62 = vpop.f32.mrb[7].mxu1  ;;  %v863_v63 = vpop.f32.mrb[11].mxu0 }
 0x1ee   :  { %v690_v0 = vpack.c.bf16 %v641_v57, %v641_v57 }
 0x1ef   :  { %963 = vtanh.bf16 %v689_v60 }
 0x1f0   :  { %965 = vtanh.bf16 %v691_v61 }
 0x1f1   :  { %967 = vtanh.bf16 %v690_v0 }
 0x1fa   :  { %v964_v2 = vpop.eup %963 }
 0x1fb   :  { %v966_v3 = vpop.eup %965 }
 0x1fc   :  { %v968_v4 = vpop.eup %967  ;;  %v808_v5 = vcombine.low %v966_v3, %v966_v3 }
 0x1fd   :  { %v807_v6 = vcombine.low %v964_v2, %v968_v4 }
 0x1fe   :  { %725 = vst.msk [vmem:[#allocation2 + $0x18] sm:$0xf] %vm724_vm3, %v808_v5 }
 0x1ff   :  { %723 = vst [vmem:[#allocation2 + $0x10] sm:$0xff] %v807_v6 }
 0x200   :  { %980 = shalt.err (!%p977_p4)
}
 0x201   :  { %s981_s18 = scalar_lea.hbm %s1261_s5, 448 }
 0x202   :  { %p982_p5 = scmp.ne.s32.totalorder %s1261_s5, %s981_s18  ;;  %p985_p6 = scmp.lt.u32.totalorder %s981_s18, %s1261_s5 }
 0x204   :  { %p987_p7 = pnand %p985_p6, %p982_p5 }
 0x206   :  { %990 = shalt.err (!%p987_p7)
}
 0x207   :  { %735 = dma.vmem_to_hbm [thread:$0]  %s733_s4, 448, %s1261_s5, [#allocation3]  }
 0x208   :  { %991 = dma.done.wait [#allocation3], 448  }
 0x209   :  { %992 = vsyncadd [#allocation3], 4294966848 }
 0x20a   :  { %739 = vsyncpa [#allocation3], 1 }

</bundles_post_ra>
